<compile_context>
chip_gen: v6e
topology: v6e:2x2x1
jax: 0.10.0
libtpu: 0.0.40
codegen_flags: <defaults>
</compile_context>

<pallas_src>
import functools

import jax
import jax.numpy as jnp
from jax.experimental import pallas as pl
from jax.experimental.pallas import tpu as pltpu


def _rnn_mlp_kernel(n_layers, n_fc, T, B_pad, *refs):
    """Whole forward pass in one kernel (everything resident in VMEM).

    refs layout:
      [x_flat (T*B_pad, obs_dim)]                        time-major rows t*B_pad + b
      + [W_ih0^T (obs_dim, H), W_hh0^T (H, H), b0 (1, H)]          layer 0
      + (n_layers-1) * [W_stack^T (2H, H), b (1, H)]               deep layers
      + n_fc * [W_fc^T, b_fc]
      + [out_ref (B_pad, act_dim), hn_ref (n_layers, B_pad, H)]
    """
    x_ref = refs[0]
    idx = 1
    w_ih0_ref, w_hh0_ref, b0_ref = refs[idx], refs[idx + 1], refs[idx + 2]
    idx += 3
    deep_refs = []
    for _ in range(n_layers - 1):
        deep_refs.append((refs[idx], refs[idx + 1]))
        idx += 2
    fc_refs = []
    for _ in range(n_fc):
        fc_refs.append((refs[idx], refs[idx + 1]))
        idx += 2
    out_ref = refs[idx]
    hn_ref = refs[idx + 1]

    H = w_hh0_ref.shape[0]
    f32 = jnp.float32

    # Hoist all weight / bias loads out of the recurrence (loaded once).
    W_ih0 = w_ih0_ref[...]
    W_hh0 = w_hh0_ref[...]
    bias0 = b0_ref[...].astype(f32)                        # (1, H)
    deep_w = [(w_ref[...], b_ref[...].astype(f32)) for (w_ref, b_ref) in deep_refs]

    x = x_ref[...].astype(f32)                             # (T*B_pad, obs_dim)

    # Layer 0 input projection for ALL timesteps in one batched MXU matmul,
    # bias folded in -> off the serial critical path.
    proj0 = jnp.dot(x, W_ih0, preferred_element_type=f32) + bias0   # (T*B_pad, H)

    # Wavefront schedule.  At wavefront step w, layer l processes timestep
    # t = w - l; every update reads only state produced in step w-1, so the
    # per-step matmuls of different layers are independent and overlap.
    h = [jnp.zeros((B_pad, H), f32) for _ in range(n_layers)]
    # TODO(synk): for large T switch this static unroll to
    # lax.fori_loop(..., unroll=4/8) with pl.ds(pl.multiple_of(t*B_pad, 8), B_pad)
    # slices to bound code size / vreg live ranges.
    for w in range(T + n_layers - 1):
        new_h = list(h)
        for l in range(n_layers):
            t = w - l
            if t < 0 or t >= T:
                continue
            if l == 0:
                # Static, sublane-aligned (B_pad multiple of 8) view of proj0.
                p_t = proj0[t * B_pad:(t + 1) * B_pad, :]
                new_h[0] = jnp.tanh(
                    p_t + jnp.dot(h[0], W_hh0, preferred_element_type=f32))
            else:
                W_stack, bias_l = deep_w[l - 1]
                # Fused input-proj + recurrence:
                #   [h_{l-1,t}, h_{l,t-1}] @ [W_ih^T; W_hh^T] + b
                inp = jnp.concatenate([h[l - 1], h[l]], axis=1)     # (B_pad, 2H)
                new_h[l] = jnp.tanh(
                    jnp.dot(inp, W_stack, preferred_element_type=f32) + bias_l)
        h = new_h

    # hn: (n_layers, B_pad, H) — final hidden state of every layer.
    for l in range(n_layers):
        hn_ref[l] = h[l]

    # out[:, -1] of the top RNN layer == final hidden of the last layer.
    y = h[n_layers - 1]
    for i, (w_ref, fb_ref) in enumerate(fc_refs):
        W = w_ref[...]
        y = jnp.dot(y, W, preferred_element_type=f32) + fb_ref[...].astype(f32)
        if i < n_fc - 1:
            y = jnp.tanh(y)
    out_ref[...] = y.astype(out_ref.dtype)


def rnn_model_forward(x, params):
    """x: (B, T, obs_dim) float32 (batch-first, like the PyTorch module)."""
    B, T, obs_dim = x.shape
    rnn_layers = params["rnn"]
    fc_layers = params["fc"]
    n_layers = len(rnn_layers)
    n_fc = len(fc_layers)
    H = rnn_layers[0]["W_hh"].shape[0]
    act_dim = fc_layers[-1][0].shape[0]

    # Pad batch up to the 8-row sublane tile so every per-timestep slice in
    # the kernel is an aligned vreg view (no sublane-extract copies on the
    # recurrence path).  Padded rows are dropped below.
    B_pad = max(8, ((B + 7) // 8) * 8)
    x_p = jnp.zeros((B_pad, T, obs_dim), jnp.float32).at[:B].set(x.astype(jnp.float32))

    # Time-major flattened input: row t*B_pad + b  <->  (timestep t, batch b).
    x_flat = jnp.transpose(x_p, (1, 0, 2)).reshape(T * B_pad, obs_dim)

    inputs = [x_flat]
    # Layer 0: separate W_ih / W_hh (input projection is batched over T up front).
    l0 = rnn_layers[0]
    inputs.append(l0["W_ih"].T.astype(jnp.float32))
    inputs.append(l0["W_hh"].T.astype(jnp.float32))
    inputs.append((l0["b_ih"] + l0["b_hh"]).reshape(1, -1).astype(jnp.float32))
    # Deeper layers: vertically stacked [W_ih^T; W_hh^T] for the fused
    # wavefront matmul (PyTorch adds b_ih + b_hh; fold them — glue, not hot path).
    for lyr in rnn_layers[1:]:
        w_stack = jnp.concatenate([lyr["W_ih"].T, lyr["W_hh"].T], axis=0)
        inputs.append(w_stack.astype(jnp.float32))
        inputs.append((lyr["b_ih"] + lyr["b_hh"]).reshape(1, -1).astype(jnp.float32))
    for (W, b) in fc_layers:
        inputs.append(W.T.astype(jnp.float32))
        inputs.append(b.reshape(1, -1).astype(jnp.float32))

    vmem_spec = pl.BlockSpec(memory_space=pltpu.MemorySpace.VMEM)
    kernel = functools.partial(_rnn_mlp_kernel, n_layers, n_fc, T, B_pad)

    # TODO(synk): if evaluated every env step, batch multiple sequences into
    # one call (larger B also fills the sublane tile) or keep weights
    # VMEM-resident across calls — per-call overhead dominates at these shapes.
    # For large B on v7x, add a batch grid with dimension_semantics=("parallel",)
    # to use both TensorCores; for very large T, time-chunk x / activations with
    # pltpu.emit_pipeline instead of keeping everything resident (64 MiB VMEM).
    out_p, hn_p = pl.pallas_call(
        kernel,
        out_shape=(
            jax.ShapeDtypeStruct((B_pad, act_dim), jnp.float32),
            jax.ShapeDtypeStruct((n_layers, B_pad, H), jnp.float32),
        ),
        in_specs=[vmem_spec] * len(inputs),
        out_specs=(vmem_spec, vmem_spec),
    )(*inputs)
    # Drop padded batch rows in the wrapper (outputs are tiny).
    return out_p[:B], hn_p[:, :B]


def reference_forward(x, params):
    """Pure-JAX reference matching torch.nn.RNN + Linear stack semantics."""
    B, T, _ = x.shape
    hs = [jnp.zeros((B, lyr["W_hh"].shape[0]), jnp.float32) for lyr in params["rnn"]]
    for t in range(T):
        inp = x[:, t, :]
        for l, lyr in enumerate(params["rnn"]):
            hs[l] = jnp.tanh(
                inp @ lyr["W_ih"].T + lyr["b_ih"] + hs[l] @ lyr["W_hh"].T + lyr["b_hh"]
            )
            inp = hs[l]
    y = hs[-1]
    for i, (W, b) in enumerate(params["fc"]):
        y = y @ W.T + b
        if i < len(params["fc"]) - 1:
            y = jnp.tanh(y)
    return y, jnp.stack(hs, axis=0)


def init_params(key, obs_dim, act_dim, rnn_hidden_size, n_layers, fc_hidden_sizes):
    """Deterministic synthetic init, mirroring the shapes in RNN_model.__init__."""
    params = {"rnn": [], "fc": []}
    bound = 1.0 / jnp.sqrt(jnp.float32(rnn_hidden_size))

    def uni(k, shape):
        return jax.random.uniform(k, shape, jnp.float32, -bound, bound)

    for l in range(n_layers):
        in_dim = obs_dim if l == 0 else rnn_hidden_size
        key, k1, k2, k3, k4 = jax.random.split(key, 5)
        params["rnn"].append(
            dict(
                W_ih=uni(k1, (rnn_hidden_size, in_dim)),
                W_hh=uni(k2, (rnn_hidden_size, rnn_hidden_size)),
                b_ih=uni(k3, (rnn_hidden_size,)),
                b_hh=uni(k4, (rnn_hidden_size,)),
            )
        )

    layer_sizes = (rnn_hidden_size,) + fc_hidden_sizes + (act_dim,)
    for i in range(len(layer_sizes) - 1):
        key, k1, k2 = jax.random.split(key, 3)
        fan_in = layer_sizes[i]
        b = 1.0 / jnp.sqrt(jnp.float32(fan_in))
        W = jax.random.uniform(k1, (layer_sizes[i + 1], fan_in), jnp.float32, -b, b)
        bb = jax.random.uniform(k2, (layer_sizes[i + 1],), jnp.float32, -b, b)
        params["fc"].append((W, bb))
    return params


if __name__ == "__main__":
    # TODO(synk): `x.is_cuda` / `.to('cpu')` device shuffle, the persistent
    # self.hx mutation, and the (unused in forward) in/out shift-scale
    # transformations have no kernel equivalent.
    obs_dim, act_dim = 8, 4
    rnn_hidden_size, n_layers = 32, 2
    fc_hidden_sizes = (32, 32)
    B, T = 2, 8

    key = jax.random.PRNGKey(0)
    key, kx = jax.random.split(key)
    x = jax.random.normal(kx, (B, T, obs_dim), jnp.float32)

    params = init_params(key, obs_dim, act_dim, rnn_hidden_size, n_layers, fc_hidden_sizes)

    out, hn = rnn_model_forward(x, params)
    out = jax.block_until_ready(out)
    hn = jax.block_until_ready(hn)

    out_ref, hn_ref = reference_forward(x, params)
    assert out.shape == (B, act_dim), out.shape
    assert hn.shape == (n_layers, B, rnn_hidden_size), hn.shape
    assert jnp.allclose(out, out_ref, atol=1e-5, rtol=1e-5)
    assert jnp.allclose(hn, hn_ref, atol=1e-5, rtol=1e-5)

    print("KERNEL_OK")
</pallas_src>

<mosaic_0001>
module attributes {stable_mosaic.version = 11 : i64} {
  func.func @_rnn_mlp_kernel(%arg0: memref<64x8xf32, #tpu.memory_space<vmem>>, %arg1: memref<8x32xf32, #tpu.memory_space<vmem>>, %arg2: memref<32x32xf32, #tpu.memory_space<vmem>>, %arg3: memref<1x32xf32, #tpu.memory_space<vmem>>, %arg4: memref<64x32xf32, #tpu.memory_space<vmem>>, %arg5: memref<1x32xf32, #tpu.memory_space<vmem>>, %arg6: memref<32x32xf32, #tpu.memory_space<vmem>>, %arg7: memref<1x32xf32, #tpu.memory_space<vmem>>, %arg8: memref<32x32xf32, #tpu.memory_space<vmem>>, %arg9: memref<1x32xf32, #tpu.memory_space<vmem>>, %arg10: memref<32x4xf32, #tpu.memory_space<vmem>>, %arg11: memref<1x4xf32, #tpu.memory_space<vmem>>, %arg12: memref<8x4xf32, #tpu.memory_space<vmem>>, %arg13: memref<2x8x32xf32, #tpu.memory_space<vmem>>) attributes {dimension_semantics = [], scalar_prefetch = 0 : i64, scratch_operands = 0 : i64, tpu.core_type = #tpu.core_type<tc>} {
    %c0 = arith.constant 0 : index
    %c0_0 = arith.constant 0 : index
    %0 = vector.load %arg1[%c0, %c0_0] : memref<8x32xf32, #tpu.memory_space<vmem>>, vector<8x32xf32>
    %c0_1 = arith.constant 0 : index
    %c0_2 = arith.constant 0 : index
    %1 = vector.load %arg2[%c0_1, %c0_2] : memref<32x32xf32, #tpu.memory_space<vmem>>, vector<32x32xf32>
    %c0_3 = arith.constant 0 : index
    %c0_4 = arith.constant 0 : index
    %2 = vector.load %arg3[%c0_3, %c0_4] : memref<1x32xf32, #tpu.memory_space<vmem>>, vector<1x32xf32>
    %c0_5 = arith.constant 0 : index
    %c0_6 = arith.constant 0 : index
    %3 = vector.load %arg4[%c0_5, %c0_6] : memref<64x32xf32, #tpu.memory_space<vmem>>, vector<64x32xf32>
    %c0_7 = arith.constant 0 : index
    %c0_8 = arith.constant 0 : index
    %4 = vector.load %arg5[%c0_7, %c0_8] : memref<1x32xf32, #tpu.memory_space<vmem>>, vector<1x32xf32>
    %c0_9 = arith.constant 0 : index
    %c0_10 = arith.constant 0 : index
    %5 = vector.load %arg0[%c0_9, %c0_10] : memref<64x8xf32, #tpu.memory_space<vmem>>, vector<64x8xf32>
    %cst = arith.constant dense<0.000000e+00> : vector<64x32xf32>
    %6 = tpu.matmul %5, %0, %cst {dimension_numbers = #tpu.dot_dimension_numbers<[1], [0], [0], [1], [0, 0, 1, 1], [], []>} : vector<64x8xf32>, vector<8x32xf32>, vector<64x32xf32> -> vector<64x32xf32>
    %7 = vector.broadcast %2 : vector<1x32xf32> to vector<64x32xf32>
    %8 = arith.addf %6, %7 : vector<64x32xf32>
    %cst_11 = arith.constant 0.000000e+00 : f32
    %9 = vector.broadcast %cst_11 : f32 to vector<8x32xf32>
    %cst_12 = arith.constant 0.000000e+00 : f32
    %10 = vector.broadcast %cst_12 : f32 to vector<8x32xf32>
    %11 = vector.extract_strided_slice %8 {offsets = [0, 0], sizes = [8, 32], strides = [1, 1]} : vector<64x32xf32> to vector<8x32xf32>
    %cst_13 = arith.constant dense<0.000000e+00> : vector<8x32xf32>
    %12 = tpu.matmul %9, %1, %cst_13 {dimension_numbers = #tpu.dot_dimension_numbers<[1], [0], [0], [1], [0, 0, 1, 1], [], []>} : vector<8x32xf32>, vector<32x32xf32>, vector<8x32xf32> -> vector<8x32xf32>
    %13 = arith.addf %11, %12 : vector<8x32xf32>
    %14 = math.tanh %13 : vector<8x32xf32>
    %15 = vector.extract_strided_slice %8 {offsets = [8, 0], sizes = [8, 32], strides = [1, 1]} : vector<64x32xf32> to vector<8x32xf32>
    %cst_14 = arith.constant dense<0.000000e+00> : vector<8x32xf32>
    %16 = tpu.matmul %14, %1, %cst_14 {dimension_numbers = #tpu.dot_dimension_numbers<[1], [0], [0], [1], [0, 0, 1, 1], [], []>} : vector<8x32xf32>, vector<32x32xf32>, vector<8x32xf32> -> vector<8x32xf32>
    %17 = arith.addf %15, %16 : vector<8x32xf32>
    %18 = math.tanh %17 : vector<8x32xf32>
    %19 = tpu.concatenate %14, %10 in 1 : vector<8x32xf32>, vector<8x32xf32> -> vector<8x64xf32>
    %cst_15 = arith.constant dense<0.000000e+00> : vector<8x32xf32>
    %20 = tpu.matmul %19, %3, %cst_15 {dimension_numbers = #tpu.dot_dimension_numbers<[1], [0], [0], [1], [0, 0, 1, 1], [], []>} : vector<8x64xf32>, vector<64x32xf32>, vector<8x32xf32> -> vector<8x32xf32>
    %21 = vector.broadcast %4 : vector<1x32xf32> to vector<8x32xf32>
    %22 = arith.addf %20, %21 : vector<8x32xf32>
    %23 = math.tanh %22 : vector<8x32xf32>
    %24 = vector.extract_strided_slice %8 {offsets = [16, 0], sizes = [8, 32], strides = [1, 1]} : vector<64x32xf32> to vector<8x32xf32>
    %cst_16 = arith.constant dense<0.000000e+00> : vector<8x32xf32>
    %25 = tpu.matmul %18, %1, %cst_16 {dimension_numbers = #tpu.dot_dimension_numbers<[1], [0], [0], [1], [0, 0, 1, 1], [], []>} : vector<8x32xf32>, vector<32x32xf32>, vector<8x32xf32> -> vector<8x32xf32>
    %26 = arith.addf %24, %25 : vector<8x32xf32>
    %27 = math.tanh %26 : vector<8x32xf32>
    %28 = tpu.concatenate %18, %23 in 1 : vector<8x32xf32>, vector<8x32xf32> -> vector<8x64xf32>
    %cst_17 = arith.constant dense<0.000000e+00> : vector<8x32xf32>
    %29 = tpu.matmul %28, %3, %cst_17 {dimension_numbers = #tpu.dot_dimension_numbers<[1], [0], [0], [1], [0, 0, 1, 1], [], []>} : vector<8x64xf32>, vector<64x32xf32>, vector<8x32xf32> -> vector<8x32xf32>
    %30 = vector.broadcast %4 : vector<1x32xf32> to vector<8x32xf32>
    %31 = arith.addf %29, %30 : vector<8x32xf32>
    %32 = math.tanh %31 : vector<8x32xf32>
    %33 = vector.extract_strided_slice %8 {offsets = [24, 0], sizes = [8, 32], strides = [1, 1]} : vector<64x32xf32> to vector<8x32xf32>
    %cst_18 = arith.constant dense<0.000000e+00> : vector<8x32xf32>
    %34 = tpu.matmul %27, %1, %cst_18 {dimension_numbers = #tpu.dot_dimension_numbers<[1], [0], [0], [1], [0, 0, 1, 1], [], []>} : vector<8x32xf32>, vector<32x32xf32>, vector<8x32xf32> -> vector<8x32xf32>
    %35 = arith.addf %33, %34 : vector<8x32xf32>
    %36 = math.tanh %35 : vector<8x32xf32>
    %37 = tpu.concatenate %27, %32 in 1 : vector<8x32xf32>, vector<8x32xf32> -> vector<8x64xf32>
    %cst_19 = arith.constant dense<0.000000e+00> : vector<8x32xf32>
    %38 = tpu.matmul %37, %3, %cst_19 {dimension_numbers = #tpu.dot_dimension_numbers<[1], [0], [0], [1], [0, 0, 1, 1], [], []>} : vector<8x64xf32>, vector<64x32xf32>, vector<8x32xf32> -> vector<8x32xf32>
    %39 = vector.broadcast %4 : vector<1x32xf32> to vector<8x32xf32>
    %40 = arith.addf %38, %39 : vector<8x32xf32>
    %41 = math.tanh %40 : vector<8x32xf32>
    %42 = vector.extract_strided_slice %8 {offsets = [32, 0], sizes = [8, 32], strides = [1, 1]} : vector<64x32xf32> to vector<8x32xf32>
    %cst_20 = arith.constant dense<0.000000e+00> : vector<8x32xf32>
    %43 = tpu.matmul %36, %1, %cst_20 {dimension_numbers = #tpu.dot_dimension_numbers<[1], [0], [0], [1], [0, 0, 1, 1], [], []>} : vector<8x32xf32>, vector<32x32xf32>, vector<8x32xf32> -> vector<8x32xf32>
    %44 = arith.addf %42, %43 : vector<8x32xf32>
    %45 = math.tanh %44 : vector<8x32xf32>
    %46 = tpu.concatenate %36, %41 in 1 : vector<8x32xf32>, vector<8x32xf32> -> vector<8x64xf32>
    %cst_21 = arith.constant dense<0.000000e+00> : vector<8x32xf32>
    %47 = tpu.matmul %46, %3, %cst_21 {dimension_numbers = #tpu.dot_dimension_numbers<[1], [0], [0], [1], [0, 0, 1, 1], [], []>} : vector<8x64xf32>, vector<64x32xf32>, vector<8x32xf32> -> vector<8x32xf32>
    %48 = vector.broadcast %4 : vector<1x32xf32> to vector<8x32xf32>
    %49 = arith.addf %47, %48 : vector<8x32xf32>
    %50 = math.tanh %49 : vector<8x32xf32>
    %51 = vector.extract_strided_slice %8 {offsets = [40, 0], sizes = [8, 32], strides = [1, 1]} : vector<64x32xf32> to vector<8x32xf32>
    %cst_22 = arith.constant dense<0.000000e+00> : vector<8x32xf32>
    %52 = tpu.matmul %45, %1, %cst_22 {dimension_numbers = #tpu.dot_dimension_numbers<[1], [0], [0], [1], [0, 0, 1, 1], [], []>} : vector<8x32xf32>, vector<32x32xf32>, vector<8x32xf32> -> vector<8x32xf32>
    %53 = arith.addf %51, %52 : vector<8x32xf32>
    %54 = math.tanh %53 : vector<8x32xf32>
    %55 = tpu.concatenate %45, %50 in 1 : vector<8x32xf32>, vector<8x32xf32> -> vector<8x64xf32>
    %cst_23 = arith.constant dense<0.000000e+00> : vector<8x32xf32>
    %56 = tpu.matmul %55, %3, %cst_23 {dimension_numbers = #tpu.dot_dimension_numbers<[1], [0], [0], [1], [0, 0, 1, 1], [], []>} : vector<8x64xf32>, vector<64x32xf32>, vector<8x32xf32> -> vector<8x32xf32>
    %57 = vector.broadcast %4 : vector<1x32xf32> to vector<8x32xf32>
    %58 = arith.addf %56, %57 : vector<8x32xf32>
    %59 = math.tanh %58 : vector<8x32xf32>
    %60 = vector.extract_strided_slice %8 {offsets = [48, 0], sizes = [8, 32], strides = [1, 1]} : vector<64x32xf32> to vector<8x32xf32>
    %cst_24 = arith.constant dense<0.000000e+00> : vector<8x32xf32>
    %61 = tpu.matmul %54, %1, %cst_24 {dimension_numbers = #tpu.dot_dimension_numbers<[1], [0], [0], [1], [0, 0, 1, 1], [], []>} : vector<8x32xf32>, vector<32x32xf32>, vector<8x32xf32> -> vector<8x32xf32>
    %62 = arith.addf %60, %61 : vector<8x32xf32>
    %63 = math.tanh %62 : vector<8x32xf32>
    %64 = tpu.concatenate %54, %59 in 1 : vector<8x32xf32>, vector<8x32xf32> -> vector<8x64xf32>
    %cst_25 = arith.constant dense<0.000000e+00> : vector<8x32xf32>
    %65 = tpu.matmul %64, %3, %cst_25 {dimension_numbers = #tpu.dot_dimension_numbers<[1], [0], [0], [1], [0, 0, 1, 1], [], []>} : vector<8x64xf32>, vector<64x32xf32>, vector<8x32xf32> -> vector<8x32xf32>
    %66 = vector.broadcast %4 : vector<1x32xf32> to vector<8x32xf32>
    %67 = arith.addf %65, %66 : vector<8x32xf32>
    %68 = math.tanh %67 : vector<8x32xf32>
    %69 = vector.extract_strided_slice %8 {offsets = [56, 0], sizes = [8, 32], strides = [1, 1]} : vector<64x32xf32> to vector<8x32xf32>
    %cst_26 = arith.constant dense<0.000000e+00> : vector<8x32xf32>
    %70 = tpu.matmul %63, %1, %cst_26 {dimension_numbers = #tpu.dot_dimension_numbers<[1], [0], [0], [1], [0, 0, 1, 1], [], []>} : vector<8x32xf32>, vector<32x32xf32>, vector<8x32xf32> -> vector<8x32xf32>
    %71 = arith.addf %69, %70 : vector<8x32xf32>
    %72 = math.tanh %71 : vector<8x32xf32>
    %73 = tpu.concatenate %63, %68 in 1 : vector<8x32xf32>, vector<8x32xf32> -> vector<8x64xf32>
    %cst_27 = arith.constant dense<0.000000e+00> : vector<8x32xf32>
    %74 = tpu.matmul %73, %3, %cst_27 {dimension_numbers = #tpu.dot_dimension_numbers<[1], [0], [0], [1], [0, 0, 1, 1], [], []>} : vector<8x64xf32>, vector<64x32xf32>, vector<8x32xf32> -> vector<8x32xf32>
    %75 = vector.broadcast %4 : vector<1x32xf32> to vector<8x32xf32>
    %76 = arith.addf %74, %75 : vector<8x32xf32>
    %77 = math.tanh %76 : vector<8x32xf32>
    %78 = tpu.concatenate %72, %77 in 1 : vector<8x32xf32>, vector<8x32xf32> -> vector<8x64xf32>
    %cst_28 = arith.constant dense<0.000000e+00> : vector<8x32xf32>
    %79 = tpu.matmul %78, %3, %cst_28 {dimension_numbers = #tpu.dot_dimension_numbers<[1], [0], [0], [1], [0, 0, 1, 1], [], []>} : vector<8x64xf32>, vector<64x32xf32>, vector<8x32xf32> -> vector<8x32xf32>
    %80 = vector.broadcast %4 : vector<1x32xf32> to vector<8x32xf32>
    %81 = arith.addf %79, %80 : vector<8x32xf32>
    %82 = math.tanh %81 : vector<8x32xf32>
    %c0_29 = arith.constant 0 : index
    %c0_30 = arith.constant 0 : index
    %c0_31 = arith.constant 0 : index
    %83 = vector.load %arg13[%c0_29, %c0_30, %c0_31] : memref<2x8x32xf32, #tpu.memory_space<vmem>>, vector<1x8x32xf32>
    %84 = vector.shape_cast %83 : vector<1x8x32xf32> to vector<8x32xf32>
    %85 = vector.shape_cast %72 : vector<8x32xf32> to vector<1x8x32xf32>
    tpu.vector_store %arg13[%c0_29, %c0_30, %c0_31], %85 {strides = array<i32>} : memref<2x8x32xf32, #tpu.memory_space<vmem>>, vector<1x8x32xf32>,
    %c1 = arith.constant 1 : index
    %c0_32 = arith.constant 0 : index
    %c0_33 = arith.constant 0 : index
    %86 = vector.load %arg13[%c1, %c0_32, %c0_33] : memref<2x8x32xf32, #tpu.memory_space<vmem>>, vector<1x8x32xf32>
    %87 = vector.shape_cast %86 : vector<1x8x32xf32> to vector<8x32xf32>
    %88 = vector.shape_cast %82 : vector<8x32xf32> to vector<1x8x32xf32>
    tpu.vector_store %arg13[%c1, %c0_32, %c0_33], %88 {strides = array<i32>} : memref<2x8x32xf32, #tpu.memory_space<vmem>>, vector<1x8x32xf32>,
    %c0_34 = arith.constant 0 : index
    %c0_35 = arith.constant 0 : index
    %89 = vector.load %arg6[%c0_34, %c0_35] : memref<32x32xf32, #tpu.memory_space<vmem>>, vector<32x32xf32>
    %cst_36 = arith.constant dense<0.000000e+00> : vector<8x32xf32>
    %90 = tpu.matmul %82, %89, %cst_36 {dimension_numbers = #tpu.dot_dimension_numbers<[1], [0], [0], [1], [0, 0, 1, 1], [], []>} : vector<8x32xf32>, vector<32x32xf32>, vector<8x32xf32> -> vector<8x32xf32>
    %c0_37 = arith.constant 0 : index
    %c0_38 = arith.constant 0 : index
    %91 = vector.load %arg7[%c0_37, %c0_38] : memref<1x32xf32, #tpu.memory_space<vmem>>, vector<1x32xf32>
    %92 = vector.broadcast %91 : vector<1x32xf32> to vector<8x32xf32>
    %93 = arith.addf %90, %92 : vector<8x32xf32>
    %94 = math.tanh %93 : vector<8x32xf32>
    %c0_39 = arith.constant 0 : index
    %c0_40 = arith.constant 0 : index
    %95 = vector.load %arg8[%c0_39, %c0_40] : memref<32x32xf32, #tpu.memory_space<vmem>>, vector<32x32xf32>
    %cst_41 = arith.constant dense<0.000000e+00> : vector<8x32xf32>
    %96 = tpu.matmul %94, %95, %cst_41 {dimension_numbers = #tpu.dot_dimension_numbers<[1], [0], [0], [1], [0, 0, 1, 1], [], []>} : vector<8x32xf32>, vector<32x32xf32>, vector<8x32xf32> -> vector<8x32xf32>
    %c0_42 = arith.constant 0 : index
    %c0_43 = arith.constant 0 : index
    %97 = vector.load %arg9[%c0_42, %c0_43] : memref<1x32xf32, #tpu.memory_space<vmem>>, vector<1x32xf32>
    %98 = vector.broadcast %97 : vector<1x32xf32> to vector<8x32xf32>
    %99 = arith.addf %96, %98 : vector<8x32xf32>
    %100 = math.tanh %99 : vector<8x32xf32>
    %c0_44 = arith.constant 0 : index
    %c0_45 = arith.constant 0 : index
    %101 = vector.load %arg10[%c0_44, %c0_45] : memref<32x4xf32, #tpu.memory_space<vmem>>, vector<32x4xf32>
    %cst_46 = arith.constant dense<0.000000e+00> : vector<8x4xf32>
    %102 = tpu.matmul %100, %101, %cst_46 {dimension_numbers = #tpu.dot_dimension_numbers<[1], [0], [0], [1], [0, 0, 1, 1], [], []>} : vector<8x32xf32>, vector<32x4xf32>, vector<8x4xf32> -> vector<8x4xf32>
    %c0_47 = arith.constant 0 : index
    %c0_48 = arith.constant 0 : index
    %103 = vector.load %arg11[%c0_47, %c0_48] : memref<1x4xf32, #tpu.memory_space<vmem>>, vector<1x4xf32>
    %104 = vector.broadcast %103 : vector<1x4xf32> to vector<8x4xf32>
    %105 = arith.addf %102, %104 : vector<8x4xf32>
    %c0_49 = arith.constant 0 : index
    %c0_50 = arith.constant 0 : index
    %106 = vector.load %arg12[%c0_49, %c0_50] : memref<8x4xf32, #tpu.memory_space<vmem>>, vector<8x4xf32>
    tpu.vector_store %arg12[%c0_49, %c0_50], %105 {strides = array<i32>} : memref<8x4xf32, #tpu.memory_space<vmem>>, vector<8x4xf32>,
    return
  }
}

</mosaic_0001>

<bundles_post_ra>
// kernel: tpu_custom_call.1
= control target key start
LH: loop header
LB: loop body
LE: loop exit
PB: predicated region body
PF: predicated region fallthrough
CT: control target
= control target key end

     0   :  { %vm73_vm0 = vcmask 64512   ;;  %v2236_v3 = vmov 0.0   ;;  %s2789_s0 = inlined_call_operand.vmem [shape: f32[64,8], index: 0, kind: input, shape index: {}]   ;;  %s2790_s1 = inlined_call_operand.vmem [shape: f32[8,32], index: 1, kind: input, shape index: {}]   ;;  %s2791_s2 = inlined_call_operand.vmem [shape: f32[32,32], index: 2, kind: input, shape index: {}]   ;;  %s2792_s3 = inlined_call_operand.vmem [shape: f32[1,32], index: 3, kind: input, shape index: {}]   ;;  %s2793_s4 = inlined_call_operand.vmem [shape: f32[64,32], index: 4, kind: input, shape index: {}]   ;;  %s2794_s5 = inlined_call_operand.vmem [shape: f32[1,32], index: 5, kind: input, shape index: {}]   ;;  %s2795_s6 = inlined_call_operand.vmem [shape: f32[32,32], index: 6, kind: input, shape index: {}]   ;;  %s2796_s7 = inlined_call_operand.vmem [shape: f32[1,32], index: 7, kind: input, shape index: {}]   ;;  %s2797_s8 = inlined_call_operand.vmem [shape: f32[32,32], index: 8, kind: input, shape index: {}]   ;;  %s2798_s9 = inlined_call_operand.vmem [shape: f32[1,32], index: 9, kind: input, shape index: {}]   ;;  %s2799_s10 = inlined_call_operand.vmem [shape: f32[32,4], index: 10, kind: input, shape index: {}]   ;;  %s2800_s11 = inlined_call_operand.vmem [shape: f32[1,4], index: 11, kind: input, shape index: {}]   ;;  %s2801_s12 = inlined_call_operand.vmem [shape: f32[8,4], index: 12, kind: output, shape index: {0}]   ;;  %s2802_s13 = inlined_call_operand.hbm [shape: f32[2,8,32], index: 13, kind: output, shape index: {1}]  }
   0x1   :  { %v44_v0 = vld [vmem:[%s2790_s1] sm:$0xff]  ;;  %v2321_v2 = vld [vmem:[%s2791_s2 + $0x18] sm:$0xff]  ;;  %1899 = vmatprep.subr.mxu1 %v2236_v3  ;;  %v60_v4 = vld [vmem:[%s2789_s0 + $0x8] sm:$0xff] }
   0x2   :  { %v59_v1 = vld [vmem:[%s2789_s0] sm:$0xff]  ;;  %1885 = vmatprep.subr.mxu0 %v44_v0  ;;  %v2331_v5 = vld [vmem:[%s2791_s2 + $0x10] sm:$0xff] }
   0x3   :  { %1886 = vmatpush3.msra.mxu0 %v44_v0  ;;  %1887 = vmatprep.mubr.msk.f32.mxu0 %vm73_vm0, %v59_v1 }
   0x4   :  { %19 = vsyncpa [#allocation3], 0  ;;  %1900 = vmatpush3.msra.mxu1 %v2321_v2  ;;  %1888 = vmatmul.mubr.msk.f32.vlgmr.msra.gmra.mxu0 %vm73_vm0, %v60_v4  ;;  %v2339_v6 = vld [vmem:[%s2791_s2 + $0x8] sm:$0xff]  ;;  %vm2237_vm1 = vmmov 0   ;;  %v2349_v7 = vld [vmem:[%s2791_s2] sm:$0xff]  ;;  %vm203_vm2 = vcmask 261120  }
   0x5   :  { %1901 = vmatprep.subr.mxu1 %v2236_v3  ;;  %1907 = vmatprep.mubr.msk.f32.mxu1 %vm2237_vm1, %v2236_v3  ;;  %v2369_v8 = vld [vmem:[%s2793_s4 + $0x38] sm:$0xff]  ;;  %v61_v9 = vld [vmem:[%s2789_s0 + $0x10] sm:$0xff]  ;;  %v2389_v12 = vld [vmem:[%s2793_s4 + $0x28] sm:$0xff]  ;;  %vm361_vm3 = vcmask 523264   ;;  %s2238_s30 = smov 32   ;;  %s2239_s15 = smov [#allocation2]  }
   0x6   :  { %1902 = vmatpush3.msra.mxu1 %v2331_v5  ;;  %1921 = vmatprep.subr.mxu0 %v2236_v3  ;;  %v62_v10 = vld [vmem:[%s2789_s0 + $0x18] sm:$0xff]  ;;  %v2382_v11 = vld [vmem:[%s2793_s4 + $0x30] sm:$0xff]  ;;  %v63_v13 = vld [vmem:[%s2789_s0 + $0x20] sm:$0xff]  ;;  %s1705_s1 = sshll.u32 %s2239_s15, 4  ;;  %s1706_s1 = int_to_ptr.vmem [resolvable:$true] %s1705_s1 }
   0x7   :  { %1903 = vmatprep.subr.mxu1 %v2236_v3  ;;  %1922 = vmatpush3.msra.mxu0 %v2369_v8  ;;  %v64_v14 = vld [vmem:[%s2789_s0 + $0x28] sm:$0xff]  ;;  %v2403_v15 = vld [vmem:[%s2793_s4 + $0x20] sm:$0xff]  ;;  %v65_v16 = vld [vmem:[%s2789_s0 + $0x30] sm:$0xff]  ;;  %s2214_s16 = scalar_lea.vmem %s1706_s1, 256  ;;  %p2219_p1 = scmp.lt.s32.totalorder %s1706_s1, %s1706_s1 }
   0x8   :  { %1904 = vmatpush3.msra.mxu1 %v2339_v6  ;;  %1890 = vmatprep.mubr.msk.f32.mxu0 %vm73_vm0, %v61_v9  ;;  %v2414_v17 = vld [vmem:[%s2793_s4 + $0x18] sm:$0xff]  ;;  %v2425_v19 = vld [vmem:[%s2793_s4 + $0x10] sm:$0xff]  ;;  %v2433_v20 = vld [vmem:[%s2793_s4 + $0x8] sm:$0xff]  ;;  %p2215_p0 = scmp.ne.s32.totalorder %s1706_s1, %s2214_s16  ;;  %p2220_p2 = scmp.lt.s32.totalorder %s2214_s16, %s2214_s16 }
   0x9   :  { %1905 = vmatprep.subr.mxu1 %v2236_v3  ;;  %1923 = vmatprep.subr.mxu0 %v2236_v3  ;;  %v66_v18 = vld [vmem:[%s2789_s0 + $0x38] sm:$0xff]  ;;  %v2442_v21 = vld [vmem:[%s2793_s4] sm:$0xff] }
   0xa   :  { %1906 = vmatpush3.msra.mxu1 %v2349_v7  ;;  %1891 = vmatmul.mubr.msk.f32.gmra.mxu0 %vm73_vm0, %v62_v10  ;;  %v2451_v23 = vld [vmem:[%s2792_s3] ss:$0 sm:$0xff]  ;;  %p2221_p3 = por %p2220_p2, %p2219_p1 }
   0xb   :  { %1908 = vmatmul.mubr.f32.vlgmr.msra.gmra.mxu1 %v2236_v3  ;;  %1910 = vmatprep.subr.mxu1 %v2236_v3  ;;  %v2499_v38 = vld [vmem:[%s2794_s5] ss:$0 sm:$0xff] }
   0xc   :  { %1911 = vmatpush3.msra.mxu1 %v2321_v2  ;;  %1918 = vmatprep.mubr.msk.f32.mxu1 %vm2237_vm1, %v2236_v3  ;;  %p2222_p4 = pnand %p2221_p3, %p2215_p0 }
   0xd   :  { %1912 = vmatprep.subr.mxu1 %v2236_v3  ;;  %1924 = vmatpush3.msra.mxu0 %v2382_v11 }
   0xe   :  { %1913 = vmatpush3.msra.mxu1 %v2331_v5  ;;  %1893 = vmatprep.mubr.msk.f32.mxu0 %vm73_vm0, %v63_v13 }
   0xf   :  { %1914 = vmatprep.subr.mxu1 %v2236_v3  ;;  %1925 = vmatprep.subr.mxu0 %v2236_v3 }
  0x10   :  { %1915 = vmatpush3.msra.mxu1 %v2339_v6  ;;  %1926 = vmatpush3.msra.mxu0 %v2389_v12 }
  0x11   :  { %1916 = vmatprep.subr.mxu1 %v2236_v3  ;;  %1927 = vmatprep.subr.mxu0 %v2236_v3 }
  0x12   :  { %1917 = vmatpush3.msra.mxu1 %v2349_v7  ;;  %1894 = vmatmul.mubr.msk.f32.gmra.mxu0 %vm73_vm0, %v64_v14 }
  0x13   :  { %1940 = vmatprep.subr.mxu1 %v2236_v3  ;;  %1928 = vmatpush3.msra.mxu0 %v2403_v15 }
  0x14   :  { %1896 = vmatprep.mubr.msk.f32.mxu0 %vm73_vm0, %v65_v16  ;;  %1929 = vmatprep.subr.mxu0 %v2236_v3 }
  0x15   :  { %1930 = vmatpush3.msra.mxu0 %v2414_v17 }
  0x16   :  { %1931 = vmatprep.subr.mxu0 %v2236_v3  ;;  %1897 = vmatmul.mubr.msk.f32.gmra.mxu0 %vm73_vm0, %v66_v18 }
  0x17   :  { %1932 = vmatpush3.msra.mxu0 %v2425_v19  ;;  %1937 = vmatprep.mubr.msk.f32.mxu0 %vm2237_vm1, %v2236_v3 }
  0x18   :  { %1933 = vmatprep.subr.mxu0 %v2236_v3 }
  0x19   :  { %1934 = vmatpush3.msra.mxu0 %v2433_v20 }
  0x1a   :  { %1935 = vmatprep.subr.mxu0 %v2236_v3 }
  0x1b   :  { %1936 = vmatpush3.msra.mxu0 %v2442_v21 }
  0x1c   :  { %1951 = vmatprep.subr.mxu0 %v2236_v3 }
  0xc4   :  { %v1889_v22 = vpop.f32.mrf.mxu0 }
  0xc5   :  { %v170_v36 = vadd.f32 %v1889_v22, %v2451_v23 }
  0xc6   :  { %v164_v24 = vpop.f32.mrf.mxu0 }
  0xc7   :  { %v165_v25 = vadd.f32 %v2451_v23, %v164_v24 }
  0xca   :  { %v2485_v31 = vpop.f32.mrf.mxu0 }
  0xcb   :  { %v273_v26 = vpop.f32.mrf.mxu1  ;;  %v180_v58 = vadd.f32 %v2485_v31, %v2451_v23 }
  0xcc   :  { %v277_v27 = vadd.f32 %v273_v26, %v165_v25  ;;  %v174_v32 = vpop.f32.mrf.mxu0 }
  0xcd   :  { %v1909_v28 = vpop.f32.mrf.mxu1  ;;  %v175_v49 = vadd.f32 %v2451_v23, %v174_v32 }
  0xce   :  { %2178 = vtanh.f32 %v277_v27 }
  0xd2   :  { %v2487_v33 = vpop.f32.mrf.mxu0 }
  0xd3   :  { %v190_v26 = vadd.f32 %v2487_v33, %v2451_v23 }
  0xd4   :  { %v2489_v34 = vpop.f32.mrf.mxu0 }
  0xd5   :  { %v185_v1 = vadd.f32 %v2451_v23, %v2489_v34 }
  0xd6   :  { %v2491_v35 = vpop.f32.mrf.mxu0 }
  0xd8   :  { %v2494_v37 = vpop.f32.mrf.mxu0 }
  0xdb   :  { %v2179_v29 = vpop.eup %2178 }
  0xdc   :  { %1919 = vmatmul.mubr.msk.f32.vlgmr.msra.gmra.mxu1 %vm203_vm2, %v2179_v29  ;;  %v354_v30 = vsel %vm203_vm2, %v2179_v29, 0.0 }
  0xdd   :  { %1938 = vmatmul.mubr.msk.f32.vlgmr.msra.gmra.mxu0 %vm361_vm3, %v354_v30  ;;  %1941 = vmatpush3.msra.mxu1 %v2321_v2 }
  0xde   :  { %1942 = vmatprep.subr.mxu1 %v2236_v3  ;;  %1948 = vmatprep.mubr.msk.f32.mxu1 %vm2237_vm1, %v2236_v3 }
  0xdf   :  { %1943 = vmatpush3.msra.mxu1 %v2331_v5  ;;  %1952 = vmatpush3.msra.mxu0 %v2369_v8 }
  0xe0   :  { %1944 = vmatprep.subr.mxu1 %v2236_v3  ;;  %1953 = vmatprep.subr.mxu0 %v2236_v3 }
  0xe1   :  { %1945 = vmatpush3.msra.mxu1 %v2339_v6  ;;  %1954 = vmatpush3.msra.mxu0 %v2382_v11 }
  0xe2   :  { %1946 = vmatprep.subr.mxu1 %v2236_v3  ;;  %1955 = vmatprep.subr.mxu0 %v2236_v3 }
  0xe3   :  { %1947 = vmatpush3.msra.mxu1 %v2349_v7  ;;  %1956 = vmatpush3.msra.mxu0 %v2389_v12 }
  0xe4   :  { %1957 = vmatprep.subr.mxu0 %v2236_v3  ;;  %1967 = vmatprep.mubr.msk.f32.mxu0 %vm2237_vm1, %v2236_v3 }
  0xe5   :  { %1958 = vmatpush3.msra.mxu0 %v2403_v15  ;;  %1970 = vmatprep.subr.mxu1 %v2236_v3 }
  0xe6   :  { %1959 = vmatprep.subr.mxu0 %v2236_v3 }
  0xe7   :  { %1960 = vmatpush3.msra.mxu0 %v2414_v17 }
  0xe8   :  { %1961 = vmatprep.subr.mxu0 %v2236_v3 }
  0xe9   :  { %1962 = vmatpush3.msra.mxu0 %v2425_v19 }
  0xea   :  { %1963 = vmatprep.subr.mxu0 %v2236_v3 }
  0xeb   :  { %1964 = vmatpush3.msra.mxu0 %v2433_v20 }
  0xec   :  { %1965 = vmatprep.subr.mxu0 %v2236_v3 }
  0xed   :  { %1966 = vmatpush3.msra.mxu0 %v2442_v21 }
  0xee   :  { %2000 = vmatprep.subr.mxu0 %v2236_v3 }
 0x19c   :  { %v348_v39 = vpop.f32.mrf.mxu1 }
 0x19d   :  { %v352_v40 = vadd.f32 %v348_v39, %v170_v36  ;;  %v431_v41 = vpop.f32.mrf.mxu0 }
 0x19e   :  { %v432_v42 = vadd.f32 %v2499_v38, %v431_v41  ;;  %v1920_v43 = vpop.f32.mrf.mxu1 }
 0x19f   :  { %2180 = vtanh.f32 %v352_v40  ;;  %v1939_v44 = vpop.f32.mrf.mxu0  ;;  %v195_v40 = vadd.f32 %v2451_v23, %v2494_v37 }
 0x1a0   :  { %2182 = vtanh.f32 %v432_v42 }
 0x1ac   :  { %v2181_v45 = vpop.eup %2180 }
 0x1ad   :  { %v2183_v46 = vpop.eup %2182  ;;  %1949 = vmatmul.mubr.msk.f32.vlgmr.msra.gmra.mxu1 %vm203_vm2, %v2181_v45 }
 0x1ae   :  { %512 = vrot.lane.b32.xlu0 %v2183_v46, %s2238_s30  ;;  %1971 = vmatpush3.msra.mxu1 %v2321_v2 }
 0x1af   :  { %1972 = vmatprep.subr.mxu1 %v2236_v3  ;;  %1978 = vmatprep.mubr.msk.f32.mxu1 %vm2237_vm1, %v2236_v3 }
 0x1b0   :  { %1973 = vmatpush3.msra.mxu1 %v2331_v5 }
 0x1b1   :  { %1974 = vmatprep.subr.mxu1 %v2236_v3 }
 0x1b2   :  { %1975 = vmatpush3.msra.mxu1 %v2339_v6 }
 0x1b3   :  { %1976 = vmatprep.subr.mxu1 %v2236_v3 }
 0x1b4   :  { %1977 = vmatpush3.msra.mxu1 %v2349_v7 }
 0x1b5   :  { %1981 = vmatprep.subr.mxu1 %v2236_v3 }
 0x220   :  { %v513_v47 = vpop.permute.xlu0 %512 }
 0x221   :  { %v515_v48 = vsel %vm203_vm2, %v2181_v45, %v513_v47 }
 0x222   :  { %1968 = vmatmul.mubr.msk.f32.vlgmr.msra.gmra.mxu0 %vm361_vm3, %v515_v48 }
 0x223   :  { %2001 = vmatpush3.msra.mxu0 %v2321_v2  ;;  %2008 = vmatprep.mubr.msk.f32.mxu0 %vm2237_vm1, %v2236_v3 }
 0x224   :  { %2002 = vmatprep.subr.mxu0 %v2236_v3 }
 0x225   :  { %2003 = vmatpush3.msra.mxu0 %v2331_v5 }
 0x226   :  { %2004 = vmatprep.subr.mxu0 %v2236_v3 }
 0x227   :  { %2005 = vmatpush3.msra.mxu0 %v2339_v6 }
 0x228   :  { %2006 = vmatprep.subr.mxu0 %v2236_v3 }
 0x229   :  { %2007 = vmatpush3.msra.mxu0 %v2349_v7 }
 0x22a   :  { %2011 = vmatprep.subr.mxu0 %v2236_v3 }
 0x26d   :  { %v505_v50 = vpop.f32.mrf.mxu1 }
 0x26e   :  { %v509_v51 = vadd.f32 %v505_v50, %v175_v49 }
 0x26f   :  { %v1950_v52 = vpop.f32.mrf.mxu1 }
 0x270   :  { %2184 = vtanh.f32 %v509_v51 }
 0x27d   :  { %v2185_v53 = vpop.eup %2184 }
 0x27e   :  { %1979 = vmatmul.mubr.msk.f32.vlgmr.msra.gmra.mxu1 %vm203_vm2, %v2185_v53 }
 0x27f   :  { %1982 = vmatpush3.msra.mxu1 %v2369_v8  ;;  %1997 = vmatprep.mubr.msk.f32.mxu1 %vm2237_vm1, %v2236_v3 }
 0x280   :  { %1983 = vmatprep.subr.mxu1 %v2236_v3 }
 0x281   :  { %1984 = vmatpush3.msra.mxu1 %v2382_v11 }
 0x282   :  { %1985 = vmatprep.subr.mxu1 %v2236_v3 }
 0x283   :  { %1986 = vmatpush3.msra.mxu1 %v2389_v12 }
 0x284   :  { %1987 = vmatprep.subr.mxu1 %v2236_v3 }
 0x285   :  { %1988 = vmatpush3.msra.mxu1 %v2403_v15 }
 0x286   :  { %1989 = vmatprep.subr.mxu1 %v2236_v3 }
 0x287   :  { %1990 = vmatpush3.msra.mxu1 %v2414_v17 }
 0x288   :  { %1991 = vmatprep.subr.mxu1 %v2236_v3 }
 0x289   :  { %1992 = vmatpush3.msra.mxu1 %v2425_v19 }
 0x28a   :  { %1993 = vmatprep.subr.mxu1 %v2236_v3 }
 0x28b   :  { %1994 = vmatpush3.msra.mxu1 %v2433_v20 }
 0x28c   :  { %1995 = vmatprep.subr.mxu1 %v2236_v3 }
 0x28d   :  { %1996 = vmatpush3.msra.mxu1 %v2442_v21 }
 0x28e   :  { %2030 = vmatprep.subr.mxu1 %v2236_v3 }
 0x2e2   :  { %v585_v54 = vpop.f32.mrf.mxu0 }
 0x2e3   :  { %v586_v55 = vadd.f32 %v2499_v38, %v585_v54  ;;  %v1444_v54 = vld [vmem:[%s2795_s6 + $0x10] sm:$0xff] }
 0x2e4   :  { %v1969_v56 = vpop.f32.mrf.mxu0 }
 0x2e5   :  { %2186 = vtanh.f32 %v586_v55  ;;  %v1443_v55 = vld [vmem:[%s2795_s6 + $0x8] sm:$0xff]  ;;  %v1442_v56 = vld [vmem:[%s2795_s6] sm:$0xff] }
 0x2f2   :  { %v2187_v57 = vpop.eup %2186 }
 0x2f3   :  { %666 = vrot.lane.b32.xlu0 %v2187_v57, %s2238_s30 }
 0x33e   :  { %v659_v59 = vpop.f32.mrf.mxu1 }
 0x33f   :  { %v663_v60 = vadd.f32 %v659_v59, %v180_v58 }
 0x340   :  { %v1980_v61 = vpop.f32.mrf.mxu1 }
 0x341   :  { %2188 = vtanh.f32 %v663_v60  ;;  %v1530_v61 = vld [vmem:[%s2797_s8 + $0x18] sm:$0xff] }
 0x34e   :  { %v2550_v62 = vpop.eup %2188 }
 0x34f   :  { %2009 = vmatmul.mubr.msk.f32.vlgmr.msra.gmra.mxu0 %vm203_vm2, %v2550_v62 }
 0x350   :  { %2012 = vmatpush3.msra.mxu0 %v2369_v8  ;;  %2027 = vmatprep.mubr.msk.f32.mxu0 %vm2237_vm1, %v2236_v3 }
 0x351   :  { %2013 = vmatprep.subr.mxu0 %v2236_v3 }
 0x352   :  { %2014 = vmatpush3.msra.mxu0 %v2382_v11 }
 0x353   :  { %2015 = vmatprep.subr.mxu0 %v2236_v3 }
 0x354   :  { %2016 = vmatpush3.msra.mxu0 %v2389_v12 }
 0x355   :  { %2017 = vmatprep.subr.mxu0 %v2236_v3 }
 0x356   :  { %2018 = vmatpush3.msra.mxu0 %v2403_v15 }
 0x357   :  { %2019 = vmatprep.subr.mxu0 %v2236_v3 }
 0x358   :  { %2020 = vmatpush3.msra.mxu0 %v2414_v17 }
 0x359   :  { %2021 = vmatprep.subr.mxu0 %v2236_v3 }
 0x35a   :  { %2022 = vmatpush3.msra.mxu0 %v2425_v19 }
 0x35b   :  { %2023 = vmatprep.subr.mxu0 %v2236_v3 }
 0x35c   :  { %2024 = vmatpush3.msra.mxu0 %v2433_v20 }
 0x35d   :  { %2025 = vmatprep.subr.mxu0 %v2236_v3 }
 0x35e   :  { %2026 = vmatpush3.msra.mxu0 %v2442_v21 }
 0x35f   :  { %2060 = vmatprep.subr.mxu0 %v2236_v3 }
 0x365   :  { %v667_v63 = vpop.permute.xlu0 %666 }
 0x366   :  { %v669_v0 = vsel %vm203_vm2, %v2185_v53, %v667_v63  ;;  %v1445_v53 = vld [vmem:[%s2795_s6 + $0x18] sm:$0xff]  ;;  %v1527_v63 = vld [vmem:[%s2797_s8] sm:$0xff] }
 0x367   :  { %1998 = vmatmul.mubr.msk.f32.vlgmr.msra.gmra.mxu1 %vm361_vm3, %v669_v0  ;;  %v1743_v0 = vld [vmem:[%s2796_s7] ss:$0 sm:$0xff] }
 0x368   :  { %2031 = vmatpush3.msra.mxu1 %v2321_v2  ;;  %2038 = vmatprep.mubr.msk.f32.mxu1 %vm2237_vm1, %v2236_v3 }
 0x369   :  { %2032 = vmatprep.subr.mxu1 %v2236_v3 }
 0x36a   :  { %2033 = vmatpush3.msra.mxu1 %v2331_v5 }
 0x36b   :  { %2034 = vmatprep.subr.mxu1 %v2236_v3 }
 0x36c   :  { %2035 = vmatpush3.msra.mxu1 %v2339_v6 }
 0x36d   :  { %2036 = vmatprep.subr.mxu1 %v2236_v3 }
 0x36e   :  { %2037 = vmatpush3.msra.mxu1 %v2349_v7 }
 0x36f   :  { %2041 = vmatprep.subr.mxu1 %v2236_v3 }
 0x40f   :  { %v813_v4 = vpop.f32.mrf.mxu0 }
 0x410   :  { %v817_v9 = vadd.f32 %v813_v4, %v185_v1 }
 0x411   :  { %v2010_v10 = vpop.f32.mrf.mxu0 }
 0x412   :  { %2190 = vtanh.f32 %v817_v9 }
 0x41f   :  { %v2586_v13 = vpop.eup %2190 }
 0x420   :  { %2039 = vmatmul.mubr.msk.f32.vlgmr.msra.gmra.mxu1 %vm203_vm2, %v2586_v13 }
 0x421   :  { %2042 = vmatpush3.msra.mxu1 %v2369_v8  ;;  %2057 = vmatprep.mubr.msk.f32.mxu1 %vm2237_vm1, %v2236_v3 }
 0x422   :  { %2043 = vmatprep.subr.mxu1 %v2236_v3 }
 0x423   :  { %2044 = vmatpush3.msra.mxu1 %v2382_v11 }
 0x424   :  { %2045 = vmatprep.subr.mxu1 %v2236_v3 }
 0x425   :  { %2046 = vmatpush3.msra.mxu1 %v2389_v12 }
 0x426   :  { %2047 = vmatprep.subr.mxu1 %v2236_v3 }
 0x427   :  { %v739_v14 = vpop.f32.mrf.mxu1  ;;  %2048 = vmatpush3.msra.mxu1 %v2403_v15 }
 0x428   :  { %v740_v16 = vadd.f32 %v2499_v38, %v739_v14  ;;  %2049 = vmatprep.subr.mxu1 %v2236_v3  ;;  %v1614_v14 = vld [vmem:[%s2799_s10 + $0x10] sm:$0xff] }
 0x429   :  { %v1999_v18 = vpop.f32.mrf.mxu1  ;;  %2050 = vmatpush3.msra.mxu1 %v2414_v17 }
 0x42a   :  { %2192 = vtanh.f32 %v740_v16  ;;  %2051 = vmatprep.subr.mxu1 %v2236_v3  ;;  %v1613_v16 = vld [vmem:[%s2799_s10 + $0x8] sm:$0xff]  ;;  %v1612_v18 = vld [vmem:[%s2799_s10] sm:$0xff] }
 0x42b   :  { %2052 = vmatpush3.msra.mxu1 %v2425_v19 }
 0x42c   :  { %2053 = vmatprep.subr.mxu1 %v2236_v3 }
 0x42d   :  { %2054 = vmatpush3.msra.mxu1 %v2433_v20 }
 0x42e   :  { %2055 = vmatprep.subr.mxu1 %v2236_v3 }
 0x42f   :  { %2056 = vmatpush3.msra.mxu1 %v2442_v21 }
 0x430   :  { %2090 = vmatprep.subr.mxu1 %v2236_v3 }
 0x437   :  { %v2193_v22 = vpop.eup %2192 }
 0x438   :  { %820 = vrot.lane.b32.xlu1 %v2193_v22, %s2238_s30  ;;  %v1745_v22 = vld [vmem:[%s2798_s9] ss:$0 sm:$0xff] }
 0x4aa   :  { %v821_v24 = vpop.permute.xlu1 %820 }
 0x4ab   :  { %v823_v25 = vsel %vm203_vm2, %v2550_v62, %v821_v24  ;;  %v1529_v62 = vld [vmem:[%s2797_s8 + $0x10] sm:$0xff] }
 0x4ac   :  { %2028 = vmatmul.mubr.msk.f32.vlgmr.msra.gmra.mxu0 %vm361_vm3, %v823_v25 }
 0x4ad   :  { %2061 = vmatpush3.msra.mxu0 %v2321_v2  ;;  %2068 = vmatprep.mubr.msk.f32.mxu0 %vm2237_vm1, %v2236_v3 }
 0x4ae   :  { %2062 = vmatprep.subr.mxu0 %v2236_v3 }
 0x4af   :  { %2063 = vmatpush3.msra.mxu0 %v2331_v5 }
 0x4b0   :  { %2064 = vmatprep.subr.mxu0 %v2236_v3 }
 0x4b1   :  { %2065 = vmatpush3.msra.mxu0 %v2339_v6 }
 0x4b2   :  { %2066 = vmatprep.subr.mxu0 %v2236_v3 }
 0x4b3   :  { %2067 = vmatpush3.msra.mxu0 %v2349_v7 }
 0x4b4   :  { %2071 = vmatprep.subr.mxu0 %v2236_v3 }
 0x4e0   :  { %v967_v27 = vpop.f32.mrf.mxu1 }
 0x4e1   :  { %v971_v28 = vadd.f32 %v967_v27, %v190_v26 }
 0x4e2   :  { %v2040_v29 = vpop.f32.mrf.mxu1 }
 0x4e3   :  { %2194 = vtanh.f32 %v971_v28 }
 0x4f0   :  { %v2625_v30 = vpop.eup %2194 }
 0x4f1   :  { %2069 = vmatmul.mubr.msk.f32.vlgmr.msra.gmra.mxu0 %vm203_vm2, %v2625_v30 }
 0x4f2   :  { %2072 = vmatpush3.msra.mxu0 %v2369_v8  ;;  %2087 = vmatprep.mubr.msk.f32.mxu0 %vm2237_vm1, %v2236_v3 }
 0x4f3   :  { %2073 = vmatprep.subr.mxu0 %v2236_v3 }
 0x4f4   :  { %2074 = vmatpush3.msra.mxu0 %v2382_v11 }
 0x4f5   :  { %2075 = vmatprep.subr.mxu0 %v2236_v3 }
 0x4f6   :  { %2076 = vmatpush3.msra.mxu0 %v2389_v12 }
 0x4f7   :  { %2077 = vmatprep.subr.mxu0 %v2236_v3 }
 0x4f8   :  { %2078 = vmatpush3.msra.mxu0 %v2403_v15 }
 0x4f9   :  { %2079 = vmatprep.subr.mxu0 %v2236_v3 }
 0x4fa   :  { %2080 = vmatpush3.msra.mxu0 %v2414_v17 }
 0x4fb   :  { %2081 = vmatprep.subr.mxu0 %v2236_v3 }
 0x4fc   :  { %2082 = vmatpush3.msra.mxu0 %v2425_v19 }
 0x4fd   :  { %2083 = vmatprep.subr.mxu0 %v2236_v3 }
 0x4fe   :  { %2084 = vmatpush3.msra.mxu0 %v2433_v20 }
 0x4ff   :  { %2085 = vmatprep.subr.mxu0 %v2236_v3 }
 0x500   :  { %2086 = vmatpush3.msra.mxu0 %v2442_v21 }
 0x501   :  { %2120 = vmatprep.subr.mxu0 %v2236_v3 }
 0x56c   :  { %v893_v31 = vpop.f32.mrf.mxu0 }
 0x56d   :  { %v894_v32 = vadd.f32 %v2499_v38, %v893_v31 }
 0x56e   :  { %v2029_v33 = vpop.f32.mrf.mxu0 }
 0x56f   :  { %2196 = vtanh.f32 %v894_v32 }
 0x57c   :  { %v2197_v34 = vpop.eup %2196 }
 0x57d   :  { %974 = vrot.lane.b32.xlu1 %v2197_v34, %s2238_s30 }
 0x5b1   :  { %v1121_v36 = vpop.f32.mrf.mxu0 }
 0x5b2   :  { %v1125_v41 = vadd.f32 %v1121_v36, %v195_v40 }
 0x5b3   :  { %v2070_v39 = vpop.f32.mrf.mxu0 }
 0x5b4   :  { %2198 = vtanh.f32 %v1125_v41 }
 0x5c1   :  { %v2199_v37 = vpop.eup %2198 }
 0x5ef   :  { %v975_v42 = vpop.permute.xlu1 %974 }
 0x5f0   :  { %v977_v43 = vsel %vm203_vm2, %v2586_v13, %v975_v42  ;;  %v1615_v13 = vld [vmem:[%s2799_s10 + $0x18] sm:$0xff] }
 0x5f1   :  { %2058 = vmatmul.mubr.msk.f32.vlgmr.msra.gmra.mxu1 %vm361_vm3, %v977_v43 }
 0x5f2   :  { %2091 = vmatpush3.msra.mxu1 %v2321_v2  ;;  %2098 = vmatprep.mubr.msk.f32.mxu1 %vm2237_vm1, %v2236_v3 }
 0x5f3   :  { %2092 = vmatprep.subr.mxu1 %v2236_v3 }
 0x5f4   :  { %2093 = vmatpush3.msra.mxu1 %v2331_v5 }
 0x5f5   :  { %2094 = vmatprep.subr.mxu1 %v2236_v3 }
 0x5f6   :  { %2095 = vmatpush3.msra.mxu1 %v2339_v6 }
 0x5f7   :  { %2096 = vmatprep.subr.mxu1 %v2236_v3 }
 0x5f8   :  { %2097 = vmatpush3.msra.mxu1 %v2349_v7  ;;  %v200_v7 = vadd.f32 %v2491_v35, %v2451_v23 }
 0x5f9   :  { %2099 = vmatmul.mubr.msk.f32.vlgmr.msra.gmra.mxu1 %vm203_vm2, %v2199_v37  ;;  %2101 = vmatprep.subr.mxu1 %v2236_v3 }
 0x5fa   :  { %2102 = vmatpush3.msra.mxu1 %v2369_v8  ;;  %2117 = vmatprep.mubr.msk.f32.mxu1 %vm2237_vm1, %v2236_v3 }
 0x5fb   :  { %2103 = vmatprep.subr.mxu1 %v2236_v3 }
 0x5fc   :  { %2104 = vmatpush3.msra.mxu1 %v2382_v11 }
 0x5fd   :  { %2105 = vmatprep.subr.mxu1 %v2236_v3 }
 0x5fe   :  { %2106 = vmatpush3.msra.mxu1 %v2389_v12 }
 0x5ff   :  { %2107 = vmatprep.subr.mxu1 %v2236_v3 }
 0x600   :  { %2108 = vmatpush3.msra.mxu1 %v2403_v15 }
 0x601   :  { %2109 = vmatprep.subr.mxu1 %v2236_v3 }
 0x602   :  { %2110 = vmatpush3.msra.mxu1 %v2414_v17 }
 0x603   :  { %2111 = vmatprep.subr.mxu1 %v2236_v3 }
 0x604   :  { %2112 = vmatpush3.msra.mxu1 %v2425_v19 }
 0x605   :  { %2113 = vmatprep.subr.mxu1 %v2236_v3 }
 0x606   :  { %2114 = vmatpush3.msra.mxu1 %v2433_v20 }
 0x607   :  { %2115 = vmatprep.subr.mxu1 %v2236_v3 }
 0x608   :  { %2116 = vmatpush3.msra.mxu1 %v2442_v21 }
 0x609   :  { %2139 = vmatprep.subr.mxu1 %v2236_v3 }
 0x6b1   :  { %v1047_v2 = vpop.f32.mrf.mxu1 }
 0x6b2   :  { %v1048_v5 = vadd.f32 %v2499_v38, %v1047_v2 }
 0x6b3   :  { %v2059_v6 = vpop.f32.mrf.mxu1 }
 0x6b4   :  { %2200 = vtanh.f32 %v1048_v5 }
 0x6b9   :  { %v1275_v44 = vpop.f32.mrf.mxu1 }
 0x6ba   :  { %v1279_v45 = vadd.f32 %v1275_v44, %v200_v7 }
 0x6bb   :  { %v2100_v46 = vpop.f32.mrf.mxu1 }
 0x6bc   :  { %2202 = vtanh.f32 %v1279_v45 }
 0x6c1   :  { %v2201_v47 = vpop.eup %2200 }
 0x6c2   :  { %1128 = vrot.lane.b32.xlu0 %v2201_v47, %s2238_s30 }
 0x6c9   :  { %v2203_v48 = vpop.eup %2202 }
 0x6ca   :  { %1439 = vst.msk [vmem:[#allocation2] sm:$0xff] %vm203_vm2, %v2203_v48 }
 0x734   :  { %v1129_v49 = vpop.permute.xlu0 %1128 }
 0x735   :  { %v1131_v50 = vsel %vm203_vm2, %v2625_v30, %v1129_v49 }
 0x736   :  { %2088 = vmatmul.mubr.msk.f32.vlgmr.msra.gmra.mxu0 %vm361_vm3, %v1131_v50 }
 0x737   :  { %2121 = vmatpush3.msra.mxu0 %v2369_v8  ;;  %2136 = vmatprep.mubr.msk.f32.mxu0 %vm2237_vm1, %v2236_v3 }
 0x738   :  { %2122 = vmatprep.subr.mxu0 %v2236_v3 }
 0x739   :  { %2123 = vmatpush3.msra.mxu0 %v2382_v11 }
 0x73a   :  { %2124 = vmatprep.subr.mxu0 %v2236_v3 }
 0x73b   :  { %2125 = vmatpush3.msra.mxu0 %v2389_v12 }
 0x73c   :  { %2126 = vmatprep.subr.mxu0 %v2236_v3 }
 0x73d   :  { %2127 = vmatpush3.msra.mxu0 %v2403_v15 }
 0x73e   :  { %2128 = vmatprep.subr.mxu0 %v2236_v3 }
 0x73f   :  { %2129 = vmatpush3.msra.mxu0 %v2414_v17 }
 0x740   :  { %2130 = vmatprep.subr.mxu0 %v2236_v3 }
 0x741   :  { %2131 = vmatpush3.msra.mxu0 %v2425_v19 }
 0x742   :  { %2132 = vmatprep.subr.mxu0 %v2236_v3 }
 0x743   :  { %2133 = vmatpush3.msra.mxu0 %v2433_v20 }
 0x744   :  { %2134 = vmatprep.subr.mxu0 %v2236_v3 }
 0x745   :  { %2135 = vmatpush3.msra.mxu0 %v2442_v21 }
 0x746   :  { %2150 = vmatprep.subr.mxu0 %v2236_v3 }
 0x7f6   :  { %v1201_v8 = vpop.f32.mrf.mxu0 }
 0x7f7   :  { %v1202_v11 = vadd.f32 %v2499_v38, %v1201_v8 }
 0x7f8   :  { %v2089_v12 = vpop.f32.mrf.mxu0 }
 0x7f9   :  { %2204 = vtanh.f32 %v1202_v11 }
 0x806   :  { %v2205_v15 = vpop.eup %2204 }
 0x807   :  { %1282 = vrot.lane.b32.xlu1 %v2205_v15, %s2238_s30 }
 0x879   :  { %v1283_v17 = vpop.permute.xlu1 %1282 }
 0x87a   :  { %v1285_v19 = vsel %vm203_vm2, %v2199_v37, %v1283_v17 }
 0x87b   :  { %2118 = vmatmul.mubr.msk.f32.vlgmr.msra.gmra.mxu1 %vm361_vm3, %v1285_v19 }
 0x87c   :  { %2147 = vmatprep.mubr.msk.f32.mxu1 %vm2237_vm1, %v2236_v3  ;;  %2140 = vmatpush3.msra.mxu1 %v1445_v53 }
 0x87d   :  { %2141 = vmatprep.subr.mxu1 %v2236_v3 }
 0x87e   :  { %2142 = vmatpush3.msra.mxu1 %v1444_v54 }
 0x87f   :  { %2143 = vmatprep.subr.mxu1 %v2236_v3 }
 0x880   :  { %2144 = vmatpush3.msra.mxu1 %v1443_v55 }
 0x881   :  { %2145 = vmatprep.subr.mxu1 %v2236_v3 }
 0x882   :  { %2146 = vmatpush3.msra.mxu1 %v1442_v56 }
 0x883   :  { %2161 = vmatprep.subr.mxu1 %v2236_v3 }
 0x93b   :  { %v1355_v20 = vpop.f32.mrf.mxu1 }
 0x93c   :  { %v1356_v21 = vadd.f32 %v2499_v38, %v1355_v20 }
 0x93d   :  { %v2119_v23 = vpop.f32.mrf.mxu1 }
 0x93e   :  { %2206 = vtanh.f32 %v1356_v21 }
 0x94b   :  { %v2207_v35 = vpop.eup %2206 }
 0x94c   :  { %1361 = vrot.lane.b32.xlu0 %v2207_v35, %s2238_s30 }
 0x9be   :  { %v1362_v51 = vpop.permute.xlu0 %1361 }
 0x9bf   :  { %v1364_v52 = vsel %vm203_vm2, %v2203_v48, %v1362_v51 }
 0x9c0   :  { %2137 = vmatmul.mubr.msk.f32.vlgmr.msra.gmra.mxu0 %vm361_vm3, %v1364_v52 }
 0x9c1   :  { %2158 = vmatprep.mubr.msk.f32.mxu0 %vm2237_vm1, %v2236_v3  ;;  %2151 = vmatpush3.msra.mxu0 %v1530_v61 }
 0x9c2   :  { %2152 = vmatprep.subr.mxu0 %v2236_v3 }
 0x9c3   :  { %2153 = vmatpush3.msra.mxu0 %v1529_v62 }
 0x9c4   :  { %2154 = vmatprep.subr.mxu0 %v2236_v3 }
 0xa80   :  { %v1434_v57 = vpop.f32.mrf.mxu0 }
 0xa81   :  { %v1435_v58 = vadd.f32 %v2499_v38, %v1434_v57  ;;  %v1528_v38 = vld [vmem:[%s2797_s8 + $0x8] sm:$0xff] }
 0xa82   :  { %v2138_v59 = vpop.f32.mrf.mxu0  ;;  %2155 = vmatpush3.msra.mxu0 %v1528_v38 }
 0xa83   :  { %2208 = vtanh.f32 %v1435_v58  ;;  %2156 = vmatprep.subr.mxu0 %v2236_v3 }
 0xa84   :  { %2157 = vmatpush3.msra.mxu0 %v1527_v63 }
 0xa90   :  { %v2209_v60 = vpop.eup %2208 }
 0xa91   :  { %1441 = vst.msk [vmem:[#allocation2 + $0x8] sm:$0xff] %vm203_vm2, %v2209_v60  ;;  %2148 = vmatmul.mubr.msk.f32.vlgmr.msra.gmra.mxu1 %vm203_vm2, %v2209_v60 }
 0xa92   :  { %2169 = vmatprep.mubr.msk.f32.mxu1 %vm2237_vm1, %v2236_v3  ;;  %2162 = vmatpush3.msra.mxu1 %v1615_v13 }
 0xa93   :  { %2163 = vmatprep.subr.mxu1 %v2236_v3 }
 0xa94   :  { %2164 = vmatpush3.msra.mxu1 %v1614_v14 }
 0xa95   :  { %2165 = vmatprep.subr.mxu1 %v2236_v3 }
 0xa96   :  { %2166 = vmatpush3.msra.mxu1 %v1613_v16 }
 0xa97   :  { %2167 = vmatprep.subr.mxu1 %v2236_v3 }
 0xa98   :  { %2168 = vmatpush3.msra.mxu1 %v1612_v18 }
 0xb51   :  { %v1522_v1 = vpop.f32.mrf.mxu1 }
 0xb52   :  { %v1523_v4 = vadd.f32 %v1743_v0, %v1522_v1 }
 0xb53   :  { %v2149_v9 = vpop.f32.mrf.mxu1 }
 0xb54   :  { %2210 = vtanh.f32 %v1523_v4 }
 0xb61   :  { %v2211_v10 = vpop.eup %2210 }
 0xb62   :  { %2159 = vmatmul.mubr.msk.f32.vlgmr.msra.gmra.mxu0 %vm203_vm2, %v2211_v10 }
 0xc22   :  { %v1607_v24 = vpop.f32.mrf.mxu0 }
 0xc23   :  { %v1608_v25 = vadd.f32 %v1745_v22, %v1607_v24 }
 0xc24   :  { %v2160_v26 = vpop.f32.mrf.mxu0 }
 0xc25   :  { %2212 = vtanh.f32 %v1608_v25 }
 0xc32   :  { %v2213_v27 = vpop.eup %2212 }
 0xc33   :  { %2170 = vmatmul.mubr.msk.f32.vlgmr.msra.gmra.mxu1 %vm203_vm2, %v2213_v27 }
 0xc34   :  { %2225 = shalt.err (!%p2222_p4)
}
 0xc35   :  { %s2240_s10 = smov 128   ;;  %s2241_s17 = smov 8   ;;  %v1747_v3 = vld [vmem:[%s2800_s11] ss:$0 sm:$0xff]  ;;  %vm1696_vm4 = vcmask 31744  }
 0xc36   :  { %1711 = dma.vmem_to_hbm [thread:$0]  %s1706_s1, 256, %s2802_s13, [#allocation3], %s2240_s10, %s2240_s10, %s2241_s17  }
 0xcf3   :  { %v1692_v28 = vpop.f32.mrf.mxu1 }
 0xcf4   :  { %v1693_v29 = vadd.f32 %v1747_v3, %v1692_v28 }
 0xcf5   :  { %v2171_v30 = vpop.f32.mrf.mxu1 }
 0xcf6   :  { %1697 = vst.msk [vmem:[%s2801_s12] sm:$0xff] %vm1696_vm4, %v1693_v29 }
 0xcf7   :  { %2234 = dma.done.wait [#allocation3], 256  }
 0xcf8   :  { %2235 = vsyncadd [#allocation3], 4294967040 }
 0xcf9   :  { %1717 = vsyncpa [#allocation3], 1 }

</bundles_post_ra>
